<compile_context>
chip_gen: v5e
topology: v5e:2x2
jax: 0.10.0
libtpu: 0.0.40
codegen_flags: <defaults>
</compile_context>

<pallas_src>
import functools

import jax
import jax.numpy as jnp
from jax.experimental import pallas as pl
from jax.experimental.pallas import tpu as pltpu


def _ch_layernorm_kernel(gamma_ref, beta_ref, x_ref, o_ref, *, eps, static_c_unroll):
    # x_ref / o_ref: (Nb, C, S, 128) VMEM blocks; gamma_ref / beta_ref: (C,) f32 SMEM.
    nb, c, s, lanes = x_ref.shape
    inv_c = 1.0 / c

    for n in range(nb):  # Nb is a small static batch fold
        if static_c_unroll:
            # ---- small C: fully static unroll; re-read VMEM slabs per pass ----
            acc = x_ref[n, 0].astype(jnp.float32)
            for i in range(1, c):
                acc = acc + x_ref[n, i].astype(jnp.float32)
            mean = acc * inv_c                                  # (S, 128)

            d = x_ref[n, 0].astype(jnp.float32) - mean
            ssq = d * d
            for i in range(1, c):
                d = x_ref[n, i].astype(jnp.float32) - mean
                ssq = ssq + d * d
            inv = jax.lax.rsqrt(ssq * inv_c + eps)              # EUP slot

            for i in range(c):
                y = (x_ref[n, i].astype(jnp.float32) - mean) * inv
                y = y * gamma_ref[i] + beta_ref[i]
                o_ref[n, i] = y.astype(o_ref.dtype)             # dense (S,128) store
        else:
            # ---- large C: bounded-unroll fori loops, dynamic channel index ----
            zero = jnp.zeros((s, lanes), jnp.float32)

            def _sum(i, acc):
                return acc + x_ref[n, pl.ds(i, 1)][0].astype(jnp.float32)

            mean = jax.lax.fori_loop(0, c, _sum, zero, unroll=4) * inv_c

            def _ssq(i, acc):
                d = x_ref[n, pl.ds(i, 1)][0].astype(jnp.float32) - mean
                return acc + d * d

            var = jax.lax.fori_loop(0, c, _ssq, zero, unroll=4) * inv_c
            inv = jax.lax.rsqrt(var + eps)

            def _wb(i, carry):
                xi = x_ref[n, pl.ds(i, 1)][0].astype(jnp.float32)
                y = (xi - mean) * inv * gamma_ref[i] + beta_ref[i]
                o_ref[n, pl.ds(i, 1)] = y.astype(o_ref.dtype)[None]
                return carry

            jax.lax.fori_loop(0, c, _wb, 0, unroll=4)


def _round_up(x, m):
    return (x + m - 1) // m * m


def _plan(n, c, hw, itemsize, budget_bytes=2 * 1024 * 1024):
    """Choose (padded HW, spatial tile S in 128-wide rows, batch fold Nb).

    Returns (hw_padded, S, Nb) such that:
      * hw_padded % 128 == 0 and the (Nb, C, S, 128) block is (8,128)-legal,
      * S is either a multiple of 8 dividing hw_padded//128, or the full extent,
      * the input block stays under ~budget_bytes (modulo an 8-row floor).
    """
    hwp = _round_up(hw, 128)
    hwr = hwp // 128
    row_bytes = c * 128 * itemsize          # one (C, 1, 128) slice per image
    per_image = hwr * row_bytes

    if per_image <= budget_bytes:
        # Full spatial extent; fold as many whole images as fit in the budget.
        nb = 1
        for cand in range(1, n + 1):
            if n % cand == 0 and cand * per_image <= budget_bytes:
                nb = cand
        return hwp, hwr, nb

    # Need to tile the spatial rows: make hwr a multiple of 8 so multiple-of-8
    # sublane tiles exist, then pick the largest divisor under the budget.
    if hwr % 8 != 0:
        hwp = _round_up(hw, 8 * 128)
        hwr = hwp // 128
    max_rows = max(8, (budget_bytes // row_bytes) // 8 * 8)
    best = 8
    s = 8
    while s <= min(hwr, max_rows):
        if hwr % s == 0:
            best = s
        s += 8
    return hwp, best, 1


def ch_layer_norm(x_nchw, gamma, beta, *, eps=1e-3):
    """x_nchw: (N, C, H, W); gamma, beta: (C,). Returns (N, C, H, W).

    Equivalent to: permute(0,2,3,1) -> nn.LayerNorm(C, eps) -> permute(0,3,1,2),
    computed in the native NCHW layout (no transposes).  Default eps=1e-3
    matches the ChLayerNorm module's default (eps=0.001).
    """
    N, C, H, W = x_nchw.shape
    HW = H * W
    x3 = x_nchw.reshape(N, C, HW)                    # free view of NCHW
    itemsize = jnp.dtype(x3.dtype).itemsize

    hwp, S, Nb = _plan(N, C, HW, itemsize)
    if hwp != HW:
        # Zero-pad the spatial axis; padded positions compute garbage that is
        # sliced away (normalization is over C, so valid positions are exact).
        x3 = jnp.pad(x3, ((0, 0), (0, 0), (0, hwp - HW)))
    hwr = hwp // 128
    x4 = x3.reshape(N, C, hwr, 128)                  # free reshape of padded buffer

    grid = (N // Nb, hwr // S)
    static_c_unroll = C <= 32
    kernel = functools.partial(_ch_layernorm_kernel, eps=float(eps),
                               static_c_unroll=static_c_unroll)

    out4 = pl.pallas_call(
        kernel,
        out_shape=jax.ShapeDtypeStruct((N, C, hwr, 128), x4.dtype),
        grid_spec=pltpu.PrefetchScalarGridSpec(
            num_scalar_prefetch=0,
            grid=grid,
            in_specs=[
                pl.BlockSpec(memory_space=pltpu.MemorySpace.SMEM),      # gamma
                pl.BlockSpec(memory_space=pltpu.MemorySpace.SMEM),      # beta
                pl.BlockSpec((Nb, C, S, 128), lambda n, s: (n, 0, s, 0)),  # x
            ],
            out_specs=pl.BlockSpec((Nb, C, S, 128), lambda n, s: (n, 0, s, 0)),
        ),
        compiler_params=pltpu.CompilerParams(
            dimension_semantics=("parallel", "parallel"),
            vmem_limit_bytes=32 * 1024 * 1024,
        ),
    )(gamma.astype(jnp.float32), beta.astype(jnp.float32), x4)

    out3 = out4.reshape(N, C, hwp)
    if hwp != HW:
        out3 = out3[:, :, :HW]
    return out3.reshape(N, C, H, W)


def _reference(x, gamma, beta, eps):
    xt = jnp.transpose(x, (0, 2, 3, 1))
    mean = jnp.mean(xt, axis=-1, keepdims=True)
    var = jnp.mean((xt - mean) ** 2, axis=-1, keepdims=True)
    ref = (xt - mean) / jnp.sqrt(var + eps) * gamma + beta
    return jnp.transpose(ref, (0, 3, 1, 2))


if __name__ == "__main__":
    key = jax.random.PRNGKey(0)
    kx, kg, kb, kx2 = jax.random.split(key, 4)

    N, C, H, W = 2, 4, 16, 16
    x = jax.random.normal(kx, (N, C, H, W), dtype=jnp.float32)
    # nn.LayerNorm defaults are weight=1, bias=0; use deterministic random
    # values instead so the affine part is actually exercised.
    gamma = 1.0 + 0.1 * jax.random.normal(kg, (C,), dtype=jnp.float32)
    beta = 0.1 * jax.random.normal(kb, (C,), dtype=jnp.float32)

    out = ch_layer_norm(x, gamma, beta, eps=1e-3)
    out = jax.block_until_ready(out)
    ref = _reference(x, gamma, beta, 1e-3)
    assert out.shape == (N, C, H, W)
    assert jnp.max(jnp.abs(out - ref)) < 1e-5

    # Also exercise the HW % 128 != 0 (padded) path on a tiny 7x7 map.
    x2 = jax.random.normal(kx2, (N, C, 7, 7), dtype=jnp.float32)
    out2 = jax.block_until_ready(ch_layer_norm(x2, gamma, beta, eps=1e-3))
    ref2 = _reference(x2, gamma, beta, 1e-3)
    assert out2.shape == (N, C, 7, 7)
    assert jnp.max(jnp.abs(out2 - ref2)) < 1e-5

    print("KERNEL_OK")
</pallas_src>

<mosaic_0001>
module attributes {stable_mosaic.version = 11 : i64} {
  func.func @_ch_layernorm_kernel(%arg0: i32, %arg1: i32, %arg2: memref<4xf32, #tpu.memory_space<smem>>, %arg3: memref<4xf32, #tpu.memory_space<smem>>, %arg4: memref<2x4x2x128xf32, #tpu.memory_space<vmem>>, %arg5: memref<2x4x2x128xf32, #tpu.memory_space<vmem>>) attributes {dimension_semantics = [#tpu.dimension_semantics<parallel>, #tpu.dimension_semantics<parallel>], iteration_bounds = array<i64: 1, 1>, scalar_prefetch = 0 : i64, scratch_operands = 0 : i64, tpu.core_type = #tpu.core_type<tc>, window_params = [{transform_indices = @transform_0, window_bounds = array<i64: 4>}, {transform_indices = @transform_1, window_bounds = array<i64: 4>}, {transform_indices = @transform_2, window_bounds = array<i64: 2, 4, 2, 128>}, {transform_indices = @transform_3, window_bounds = array<i64: 2, 4, 2, 128>}]} {
    %c0 = arith.constant 0 : index
    %c0_0 = arith.constant 0 : index
    %c0_1 = arith.constant 0 : index
    %c0_2 = arith.constant 0 : index
    %0 = vector.load %arg4[%c0, %c0_0, %c0_1, %c0_2] : memref<2x4x2x128xf32, #tpu.memory_space<vmem>>, vector<1x1x2x128xf32>
    %1 = vector.shape_cast %0 : vector<1x1x2x128xf32> to vector<2x128xf32>
    %c0_3 = arith.constant 0 : index
    %c1 = arith.constant 1 : index
    %c0_4 = arith.constant 0 : index
    %c0_5 = arith.constant 0 : index
    %2 = vector.load %arg4[%c0_3, %c1, %c0_4, %c0_5] : memref<2x4x2x128xf32, #tpu.memory_space<vmem>>, vector<1x1x2x128xf32>
    %3 = vector.shape_cast %2 : vector<1x1x2x128xf32> to vector<2x128xf32>
    %4 = arith.addf %1, %3 : vector<2x128xf32>
    %c0_6 = arith.constant 0 : index
    %c2 = arith.constant 2 : index
    %c0_7 = arith.constant 0 : index
    %c0_8 = arith.constant 0 : index
    %5 = vector.load %arg4[%c0_6, %c2, %c0_7, %c0_8] : memref<2x4x2x128xf32, #tpu.memory_space<vmem>>, vector<1x1x2x128xf32>
    %6 = vector.shape_cast %5 : vector<1x1x2x128xf32> to vector<2x128xf32>
    %7 = arith.addf %4, %6 : vector<2x128xf32>
    %c0_9 = arith.constant 0 : index
    %c3 = arith.constant 3 : index
    %c0_10 = arith.constant 0 : index
    %c0_11 = arith.constant 0 : index
    %8 = vector.load %arg4[%c0_9, %c3, %c0_10, %c0_11] : memref<2x4x2x128xf32, #tpu.memory_space<vmem>>, vector<1x1x2x128xf32>
    %9 = vector.shape_cast %8 : vector<1x1x2x128xf32> to vector<2x128xf32>
    %10 = arith.addf %7, %9 : vector<2x128xf32>
    %cst = arith.constant 2.500000e-01 : f32
    %11 = vector.broadcast %cst : f32 to vector<2x128xf32>
    %12 = arith.mulf %10, %11 : vector<2x128xf32>
    %c0_12 = arith.constant 0 : index
    %c0_13 = arith.constant 0 : index
    %c0_14 = arith.constant 0 : index
    %c0_15 = arith.constant 0 : index
    %13 = vector.load %arg4[%c0_12, %c0_13, %c0_14, %c0_15] : memref<2x4x2x128xf32, #tpu.memory_space<vmem>>, vector<1x1x2x128xf32>
    %14 = vector.shape_cast %13 : vector<1x1x2x128xf32> to vector<2x128xf32>
    %15 = arith.subf %14, %12 : vector<2x128xf32>
    %16 = arith.mulf %15, %15 : vector<2x128xf32>
    %c0_16 = arith.constant 0 : index
    %c1_17 = arith.constant 1 : index
    %c0_18 = arith.constant 0 : index
    %c0_19 = arith.constant 0 : index
    %17 = vector.load %arg4[%c0_16, %c1_17, %c0_18, %c0_19] : memref<2x4x2x128xf32, #tpu.memory_space<vmem>>, vector<1x1x2x128xf32>
    %18 = vector.shape_cast %17 : vector<1x1x2x128xf32> to vector<2x128xf32>
    %19 = arith.subf %18, %12 : vector<2x128xf32>
    %20 = arith.mulf %19, %19 : vector<2x128xf32>
    %21 = arith.addf %16, %20 : vector<2x128xf32>
    %c0_20 = arith.constant 0 : index
    %c2_21 = arith.constant 2 : index
    %c0_22 = arith.constant 0 : index
    %c0_23 = arith.constant 0 : index
    %22 = vector.load %arg4[%c0_20, %c2_21, %c0_22, %c0_23] : memref<2x4x2x128xf32, #tpu.memory_space<vmem>>, vector<1x1x2x128xf32>
    %23 = vector.shape_cast %22 : vector<1x1x2x128xf32> to vector<2x128xf32>
    %24 = arith.subf %23, %12 : vector<2x128xf32>
    %25 = arith.mulf %24, %24 : vector<2x128xf32>
    %26 = arith.addf %21, %25 : vector<2x128xf32>
    %c0_24 = arith.constant 0 : index
    %c3_25 = arith.constant 3 : index
    %c0_26 = arith.constant 0 : index
    %c0_27 = arith.constant 0 : index
    %27 = vector.load %arg4[%c0_24, %c3_25, %c0_26, %c0_27] : memref<2x4x2x128xf32, #tpu.memory_space<vmem>>, vector<1x1x2x128xf32>
    %28 = vector.shape_cast %27 : vector<1x1x2x128xf32> to vector<2x128xf32>
    %29 = arith.subf %28, %12 : vector<2x128xf32>
    %30 = arith.mulf %29, %29 : vector<2x128xf32>
    %31 = arith.addf %26, %30 : vector<2x128xf32>
    %cst_28 = arith.constant 2.500000e-01 : f32
    %32 = vector.broadcast %cst_28 : f32 to vector<2x128xf32>
    %33 = arith.mulf %31, %32 : vector<2x128xf32>
    %cst_29 = arith.constant 1.000000e-03 : f32
    %34 = vector.broadcast %cst_29 : f32 to vector<2x128xf32>
    %35 = arith.addf %33, %34 : vector<2x128xf32>
    %36 = math.rsqrt %35 : vector<2x128xf32>
    %c0_30 = arith.constant 0 : index
    %c0_31 = arith.constant 0 : index
    %c0_32 = arith.constant 0 : index
    %c0_33 = arith.constant 0 : index
    %37 = vector.load %arg4[%c0_30, %c0_31, %c0_32, %c0_33] : memref<2x4x2x128xf32, #tpu.memory_space<vmem>>, vector<1x1x2x128xf32>
    %38 = vector.shape_cast %37 : vector<1x1x2x128xf32> to vector<2x128xf32>
    %39 = arith.subf %38, %12 : vector<2x128xf32>
    %40 = arith.mulf %39, %36 : vector<2x128xf32>
    %c0_34 = arith.constant 0 : index
    %41 = memref.load %arg2[%c0_34] : memref<4xf32, #tpu.memory_space<smem>>
    %42 = vector.broadcast %41 : f32 to vector<2x128xf32>
    %43 = arith.mulf %40, %42 : vector<2x128xf32>
    %c0_35 = arith.constant 0 : index
    %44 = memref.load %arg3[%c0_35] : memref<4xf32, #tpu.memory_space<smem>>
    %45 = vector.broadcast %44 : f32 to vector<2x128xf32>
    %46 = arith.addf %43, %45 : vector<2x128xf32>
    %c0_36 = arith.constant 0 : index
    %c0_37 = arith.constant 0 : index
    %c0_38 = arith.constant 0 : index
    %c0_39 = arith.constant 0 : index
    %47 = vector.load %arg5[%c0_36, %c0_37, %c0_38, %c0_39] : memref<2x4x2x128xf32, #tpu.memory_space<vmem>>, vector<1x1x2x128xf32>
    %48 = vector.shape_cast %47 : vector<1x1x2x128xf32> to vector<2x128xf32>
    %49 = vector.shape_cast %46 : vector<2x128xf32> to vector<1x1x2x128xf32>
    tpu.vector_store %arg5[%c0_36, %c0_37, %c0_38, %c0_39], %49 {strides = array<i32>} : memref<2x4x2x128xf32, #tpu.memory_space<vmem>>, vector<1x1x2x128xf32>,
    %c0_40 = arith.constant 0 : index
    %c1_41 = arith.constant 1 : index
    %c0_42 = arith.constant 0 : index
    %c0_43 = arith.constant 0 : index
    %50 = vector.load %arg4[%c0_40, %c1_41, %c0_42, %c0_43] : memref<2x4x2x128xf32, #tpu.memory_space<vmem>>, vector<1x1x2x128xf32>
    %51 = vector.shape_cast %50 : vector<1x1x2x128xf32> to vector<2x128xf32>
    %52 = arith.subf %51, %12 : vector<2x128xf32>
    %53 = arith.mulf %52, %36 : vector<2x128xf32>
    %c1_44 = arith.constant 1 : index
    %54 = memref.load %arg2[%c1_44] : memref<4xf32, #tpu.memory_space<smem>>
    %55 = vector.broadcast %54 : f32 to vector<2x128xf32>
    %56 = arith.mulf %53, %55 : vector<2x128xf32>
    %c1_45 = arith.constant 1 : index
    %57 = memref.load %arg3[%c1_45] : memref<4xf32, #tpu.memory_space<smem>>
    %58 = vector.broadcast %57 : f32 to vector<2x128xf32>
    %59 = arith.addf %56, %58 : vector<2x128xf32>
    %c0_46 = arith.constant 0 : index
    %c1_47 = arith.constant 1 : index
    %c0_48 = arith.constant 0 : index
    %c0_49 = arith.constant 0 : index
    %60 = vector.load %arg5[%c0_46, %c1_47, %c0_48, %c0_49] : memref<2x4x2x128xf32, #tpu.memory_space<vmem>>, vector<1x1x2x128xf32>
    %61 = vector.shape_cast %60 : vector<1x1x2x128xf32> to vector<2x128xf32>
    %62 = vector.shape_cast %59 : vector<2x128xf32> to vector<1x1x2x128xf32>
    tpu.vector_store %arg5[%c0_46, %c1_47, %c0_48, %c0_49], %62 {strides = array<i32>} : memref<2x4x2x128xf32, #tpu.memory_space<vmem>>, vector<1x1x2x128xf32>,
    %c0_50 = arith.constant 0 : index
    %c2_51 = arith.constant 2 : index
    %c0_52 = arith.constant 0 : index
    %c0_53 = arith.constant 0 : index
    %63 = vector.load %arg4[%c0_50, %c2_51, %c0_52, %c0_53] : memref<2x4x2x128xf32, #tpu.memory_space<vmem>>, vector<1x1x2x128xf32>
    %64 = vector.shape_cast %63 : vector<1x1x2x128xf32> to vector<2x128xf32>
    %65 = arith.subf %64, %12 : vector<2x128xf32>
    %66 = arith.mulf %65, %36 : vector<2x128xf32>
    %c2_54 = arith.constant 2 : index
    %67 = memref.load %arg2[%c2_54] : memref<4xf32, #tpu.memory_space<smem>>
    %68 = vector.broadcast %67 : f32 to vector<2x128xf32>
    %69 = arith.mulf %66, %68 : vector<2x128xf32>
    %c2_55 = arith.constant 2 : index
    %70 = memref.load %arg3[%c2_55] : memref<4xf32, #tpu.memory_space<smem>>
    %71 = vector.broadcast %70 : f32 to vector<2x128xf32>
    %72 = arith.addf %69, %71 : vector<2x128xf32>
    %c0_56 = arith.constant 0 : index
    %c2_57 = arith.constant 2 : index
    %c0_58 = arith.constant 0 : index
    %c0_59 = arith.constant 0 : index
    %73 = vector.load %arg5[%c0_56, %c2_57, %c0_58, %c0_59] : memref<2x4x2x128xf32, #tpu.memory_space<vmem>>, vector<1x1x2x128xf32>
    %74 = vector.shape_cast %73 : vector<1x1x2x128xf32> to vector<2x128xf32>
    %75 = vector.shape_cast %72 : vector<2x128xf32> to vector<1x1x2x128xf32>
    tpu.vector_store %arg5[%c0_56, %c2_57, %c0_58, %c0_59], %75 {strides = array<i32>} : memref<2x4x2x128xf32, #tpu.memory_space<vmem>>, vector<1x1x2x128xf32>,
    %c0_60 = arith.constant 0 : index
    %c3_61 = arith.constant 3 : index
    %c0_62 = arith.constant 0 : index
    %c0_63 = arith.constant 0 : index
    %76 = vector.load %arg4[%c0_60, %c3_61, %c0_62, %c0_63] : memref<2x4x2x128xf32, #tpu.memory_space<vmem>>, vector<1x1x2x128xf32>
    %77 = vector.shape_cast %76 : vector<1x1x2x128xf32> to vector<2x128xf32>
    %78 = arith.subf %77, %12 : vector<2x128xf32>
    %79 = arith.mulf %78, %36 : vector<2x128xf32>
    %c3_64 = arith.constant 3 : index
    %80 = memref.load %arg2[%c3_64] : memref<4xf32, #tpu.memory_space<smem>>
    %81 = vector.broadcast %80 : f32 to vector<2x128xf32>
    %82 = arith.mulf %79, %81 : vector<2x128xf32>
    %c3_65 = arith.constant 3 : index
    %83 = memref.load %arg3[%c3_65] : memref<4xf32, #tpu.memory_space<smem>>
    %84 = vector.broadcast %83 : f32 to vector<2x128xf32>
    %85 = arith.addf %82, %84 : vector<2x128xf32>
    %c0_66 = arith.constant 0 : index
    %c3_67 = arith.constant 3 : index
    %c0_68 = arith.constant 0 : index
    %c0_69 = arith.constant 0 : index
    %86 = vector.load %arg5[%c0_66, %c3_67, %c0_68, %c0_69] : memref<2x4x2x128xf32, #tpu.memory_space<vmem>>, vector<1x1x2x128xf32>
    %87 = vector.shape_cast %86 : vector<1x1x2x128xf32> to vector<2x128xf32>
    %88 = vector.shape_cast %85 : vector<2x128xf32> to vector<1x1x2x128xf32>
    tpu.vector_store %arg5[%c0_66, %c3_67, %c0_68, %c0_69], %88 {strides = array<i32>} : memref<2x4x2x128xf32, #tpu.memory_space<vmem>>, vector<1x1x2x128xf32>,
    %c1_70 = arith.constant 1 : index
    %c0_71 = arith.constant 0 : index
    %c0_72 = arith.constant 0 : index
    %c0_73 = arith.constant 0 : index
    %89 = vector.load %arg4[%c1_70, %c0_71, %c0_72, %c0_73] : memref<2x4x2x128xf32, #tpu.memory_space<vmem>>, vector<1x1x2x128xf32>
    %90 = vector.shape_cast %89 : vector<1x1x2x128xf32> to vector<2x128xf32>
    %c1_74 = arith.constant 1 : index
    %c1_75 = arith.constant 1 : index
    %c0_76 = arith.constant 0 : index
    %c0_77 = arith.constant 0 : index
    %91 = vector.load %arg4[%c1_74, %c1_75, %c0_76, %c0_77] : memref<2x4x2x128xf32, #tpu.memory_space<vmem>>, vector<1x1x2x128xf32>
    %92 = vector.shape_cast %91 : vector<1x1x2x128xf32> to vector<2x128xf32>
    %93 = arith.addf %90, %92 : vector<2x128xf32>
    %c1_78 = arith.constant 1 : index
    %c2_79 = arith.constant 2 : index
    %c0_80 = arith.constant 0 : index
    %c0_81 = arith.constant 0 : index
    %94 = vector.load %arg4[%c1_78, %c2_79, %c0_80, %c0_81] : memref<2x4x2x128xf32, #tpu.memory_space<vmem>>, vector<1x1x2x128xf32>
    %95 = vector.shape_cast %94 : vector<1x1x2x128xf32> to vector<2x128xf32>
    %96 = arith.addf %93, %95 : vector<2x128xf32>
    %c1_82 = arith.constant 1 : index
    %c3_83 = arith.constant 3 : index
    %c0_84 = arith.constant 0 : index
    %c0_85 = arith.constant 0 : index
    %97 = vector.load %arg4[%c1_82, %c3_83, %c0_84, %c0_85] : memref<2x4x2x128xf32, #tpu.memory_space<vmem>>, vector<1x1x2x128xf32>
    %98 = vector.shape_cast %97 : vector<1x1x2x128xf32> to vector<2x128xf32>
    %99 = arith.addf %96, %98 : vector<2x128xf32>
    %cst_86 = arith.constant 2.500000e-01 : f32
    %100 = vector.broadcast %cst_86 : f32 to vector<2x128xf32>
    %101 = arith.mulf %99, %100 : vector<2x128xf32>
    %c1_87 = arith.constant 1 : index
    %c0_88 = arith.constant 0 : index
    %c0_89 = arith.constant 0 : index
    %c0_90 = arith.constant 0 : index
    %102 = vector.load %arg4[%c1_87, %c0_88, %c0_89, %c0_90] : memref<2x4x2x128xf32, #tpu.memory_space<vmem>>, vector<1x1x2x128xf32>
    %103 = vector.shape_cast %102 : vector<1x1x2x128xf32> to vector<2x128xf32>
    %104 = arith.subf %103, %101 : vector<2x128xf32>
    %105 = arith.mulf %104, %104 : vector<2x128xf32>
    %c1_91 = arith.constant 1 : index
    %c1_92 = arith.constant 1 : index
    %c0_93 = arith.constant 0 : index
    %c0_94 = arith.constant 0 : index
    %106 = vector.load %arg4[%c1_91, %c1_92, %c0_93, %c0_94] : memref<2x4x2x128xf32, #tpu.memory_space<vmem>>, vector<1x1x2x128xf32>
    %107 = vector.shape_cast %106 : vector<1x1x2x128xf32> to vector<2x128xf32>
    %108 = arith.subf %107, %101 : vector<2x128xf32>
    %109 = arith.mulf %108, %108 : vector<2x128xf32>
    %110 = arith.addf %105, %109 : vector<2x128xf32>
    %c1_95 = arith.constant 1 : index
    %c2_96 = arith.constant 2 : index
    %c0_97 = arith.constant 0 : index
    %c0_98 = arith.constant 0 : index
    %111 = vector.load %arg4[%c1_95, %c2_96, %c0_97, %c0_98] : memref<2x4x2x128xf32, #tpu.memory_space<vmem>>, vector<1x1x2x128xf32>
    %112 = vector.shape_cast %111 : vector<1x1x2x128xf32> to vector<2x128xf32>
    %113 = arith.subf %112, %101 : vector<2x128xf32>
    %114 = arith.mulf %113, %113 : vector<2x128xf32>
    %115 = arith.addf %110, %114 : vector<2x128xf32>
    %c1_99 = arith.constant 1 : index
    %c3_100 = arith.constant 3 : index
    %c0_101 = arith.constant 0 : index
    %c0_102 = arith.constant 0 : index
    %116 = vector.load %arg4[%c1_99, %c3_100, %c0_101, %c0_102] : memref<2x4x2x128xf32, #tpu.memory_space<vmem>>, vector<1x1x2x128xf32>
    %117 = vector.shape_cast %116 : vector<1x1x2x128xf32> to vector<2x128xf32>
    %118 = arith.subf %117, %101 : vector<2x128xf32>
    %119 = arith.mulf %118, %118 : vector<2x128xf32>
    %120 = arith.addf %115, %119 : vector<2x128xf32>
    %cst_103 = arith.constant 2.500000e-01 : f32
    %121 = vector.broadcast %cst_103 : f32 to vector<2x128xf32>
    %122 = arith.mulf %120, %121 : vector<2x128xf32>
    %cst_104 = arith.constant 1.000000e-03 : f32
    %123 = vector.broadcast %cst_104 : f32 to vector<2x128xf32>
    %124 = arith.addf %122, %123 : vector<2x128xf32>
    %125 = math.rsqrt %124 : vector<2x128xf32>
    %c1_105 = arith.constant 1 : index
    %c0_106 = arith.constant 0 : index
    %c0_107 = arith.constant 0 : index
    %c0_108 = arith.constant 0 : index
    %126 = vector.load %arg4[%c1_105, %c0_106, %c0_107, %c0_108] : memref<2x4x2x128xf32, #tpu.memory_space<vmem>>, vector<1x1x2x128xf32>
    %127 = vector.shape_cast %126 : vector<1x1x2x128xf32> to vector<2x128xf32>
    %128 = arith.subf %127, %101 : vector<2x128xf32>
    %129 = arith.mulf %128, %125 : vector<2x128xf32>
    %c0_109 = arith.constant 0 : index
    %130 = memref.load %arg2[%c0_109] : memref<4xf32, #tpu.memory_space<smem>>
    %131 = vector.broadcast %130 : f32 to vector<2x128xf32>
    %132 = arith.mulf %129, %131 : vector<2x128xf32>
    %c0_110 = arith.constant 0 : index
    %133 = memref.load %arg3[%c0_110] : memref<4xf32, #tpu.memory_space<smem>>
    %134 = vector.broadcast %133 : f32 to vector<2x128xf32>
    %135 = arith.addf %132, %134 : vector<2x128xf32>
    %c1_111 = arith.constant 1 : index
    %c0_112 = arith.constant 0 : index
    %c0_113 = arith.constant 0 : index
    %c0_114 = arith.constant 0 : index
    %136 = vector.load %arg5[%c1_111, %c0_112, %c0_113, %c0_114] : memref<2x4x2x128xf32, #tpu.memory_space<vmem>>, vector<1x1x2x128xf32>
    %137 = vector.shape_cast %136 : vector<1x1x2x128xf32> to vector<2x128xf32>
    %138 = vector.shape_cast %135 : vector<2x128xf32> to vector<1x1x2x128xf32>
    tpu.vector_store %arg5[%c1_111, %c0_112, %c0_113, %c0_114], %138 {strides = array<i32>} : memref<2x4x2x128xf32, #tpu.memory_space<vmem>>, vector<1x1x2x128xf32>,
    %c1_115 = arith.constant 1 : index
    %c1_116 = arith.constant 1 : index
    %c0_117 = arith.constant 0 : index
    %c0_118 = arith.constant 0 : index
    %139 = vector.load %arg4[%c1_115, %c1_116, %c0_117, %c0_118] : memref<2x4x2x128xf32, #tpu.memory_space<vmem>>, vector<1x1x2x128xf32>
    %140 = vector.shape_cast %139 : vector<1x1x2x128xf32> to vector<2x128xf32>
    %141 = arith.subf %140, %101 : vector<2x128xf32>
    %142 = arith.mulf %141, %125 : vector<2x128xf32>
    %c1_119 = arith.constant 1 : index
    %143 = memref.load %arg2[%c1_119] : memref<4xf32, #tpu.memory_space<smem>>
    %144 = vector.broadcast %143 : f32 to vector<2x128xf32>
    %145 = arith.mulf %142, %144 : vector<2x128xf32>
    %c1_120 = arith.constant 1 : index
    %146 = memref.load %arg3[%c1_120] : memref<4xf32, #tpu.memory_space<smem>>
    %147 = vector.broadcast %146 : f32 to vector<2x128xf32>
    %148 = arith.addf %145, %147 : vector<2x128xf32>
    %c1_121 = arith.constant 1 : index
    %c1_122 = arith.constant 1 : index
    %c0_123 = arith.constant 0 : index
    %c0_124 = arith.constant 0 : index
    %149 = vector.load %arg5[%c1_121, %c1_122, %c0_123, %c0_124] : memref<2x4x2x128xf32, #tpu.memory_space<vmem>>, vector<1x1x2x128xf32>
    %150 = vector.shape_cast %149 : vector<1x1x2x128xf32> to vector<2x128xf32>
    %151 = vector.shape_cast %148 : vector<2x128xf32> to vector<1x1x2x128xf32>
    tpu.vector_store %arg5[%c1_121, %c1_122, %c0_123, %c0_124], %151 {strides = array<i32>} : memref<2x4x2x128xf32, #tpu.memory_space<vmem>>, vector<1x1x2x128xf32>,
    %c1_125 = arith.constant 1 : index
    %c2_126 = arith.constant 2 : index
    %c0_127 = arith.constant 0 : index
    %c0_128 = arith.constant 0 : index
    %152 = vector.load %arg4[%c1_125, %c2_126, %c0_127, %c0_128] : memref<2x4x2x128xf32, #tpu.memory_space<vmem>>, vector<1x1x2x128xf32>
    %153 = vector.shape_cast %152 : vector<1x1x2x128xf32> to vector<2x128xf32>
    %154 = arith.subf %153, %101 : vector<2x128xf32>
    %155 = arith.mulf %154, %125 : vector<2x128xf32>
    %c2_129 = arith.constant 2 : index
    %156 = memref.load %arg2[%c2_129] : memref<4xf32, #tpu.memory_space<smem>>
    %157 = vector.broadcast %156 : f32 to vector<2x128xf32>
    %158 = arith.mulf %155, %157 : vector<2x128xf32>
    %c2_130 = arith.constant 2 : index
    %159 = memref.load %arg3[%c2_130] : memref<4xf32, #tpu.memory_space<smem>>
    %160 = vector.broadcast %159 : f32 to vector<2x128xf32>
    %161 = arith.addf %158, %160 : vector<2x128xf32>
    %c1_131 = arith.constant 1 : index
    %c2_132 = arith.constant 2 : index
    %c0_133 = arith.constant 0 : index
    %c0_134 = arith.constant 0 : index
    %162 = vector.load %arg5[%c1_131, %c2_132, %c0_133, %c0_134] : memref<2x4x2x128xf32, #tpu.memory_space<vmem>>, vector<1x1x2x128xf32>
    %163 = vector.shape_cast %162 : vector<1x1x2x128xf32> to vector<2x128xf32>
    %164 = vector.shape_cast %161 : vector<2x128xf32> to vector<1x1x2x128xf32>
    tpu.vector_store %arg5[%c1_131, %c2_132, %c0_133, %c0_134], %164 {strides = array<i32>} : memref<2x4x2x128xf32, #tpu.memory_space<vmem>>, vector<1x1x2x128xf32>,
    %c1_135 = arith.constant 1 : index
    %c3_136 = arith.constant 3 : index
    %c0_137 = arith.constant 0 : index
    %c0_138 = arith.constant 0 : index
    %165 = vector.load %arg4[%c1_135, %c3_136, %c0_137, %c0_138] : memref<2x4x2x128xf32, #tpu.memory_space<vmem>>, vector<1x1x2x128xf32>
    %166 = vector.shape_cast %165 : vector<1x1x2x128xf32> to vector<2x128xf32>
    %167 = arith.subf %166, %101 : vector<2x128xf32>
    %168 = arith.mulf %167, %125 : vector<2x128xf32>
    %c3_139 = arith.constant 3 : index
    %169 = memref.load %arg2[%c3_139] : memref<4xf32, #tpu.memory_space<smem>>
    %170 = vector.broadcast %169 : f32 to vector<2x128xf32>
    %171 = arith.mulf %168, %170 : vector<2x128xf32>
    %c3_140 = arith.constant 3 : index
    %172 = memref.load %arg3[%c3_140] : memref<4xf32, #tpu.memory_space<smem>>
    %173 = vector.broadcast %172 : f32 to vector<2x128xf32>
    %174 = arith.addf %171, %173 : vector<2x128xf32>
    %c1_141 = arith.constant 1 : index
    %c3_142 = arith.constant 3 : index
    %c0_143 = arith.constant 0 : index
    %c0_144 = arith.constant 0 : index
    %175 = vector.load %arg5[%c1_141, %c3_142, %c0_143, %c0_144] : memref<2x4x2x128xf32, #tpu.memory_space<vmem>>, vector<1x1x2x128xf32>
    %176 = vector.shape_cast %175 : vector<1x1x2x128xf32> to vector<2x128xf32>
    %177 = vector.shape_cast %174 : vector<2x128xf32> to vector<1x1x2x128xf32>
    tpu.vector_store %arg5[%c1_141, %c3_142, %c0_143, %c0_144], %177 {strides = array<i32>} : memref<2x4x2x128xf32, #tpu.memory_space<vmem>>, vector<1x1x2x128xf32>,
    return
  }
  func.func @transform_0(%arg0: i32, %arg1: i32) -> i32 {
    %c0_i32 = arith.constant 0 : i32
    %c0_i32_0 = arith.constant 0 : i32
    return %c0_i32 : i32
  }
  func.func @transform_1(%arg0: i32, %arg1: i32) -> i32 {
    %c0_i32 = arith.constant 0 : i32
    %c0_i32_0 = arith.constant 0 : i32
    return %c0_i32 : i32
  }
  func.func @transform_2(%arg0: i32, %arg1: i32) -> (i32, i32, i32, i32) {
    %c0_i32 = arith.constant 0 : i32
    %c0_i32_0 = arith.constant 0 : i32
    %c0_i32_1 = arith.constant 0 : i32
    return %arg0, %c0_i32, %arg1, %c0_i32_0 : i32, i32, i32, i32
  }
  func.func @transform_3(%arg0: i32, %arg1: i32) -> (i32, i32, i32, i32) {
    %c0_i32 = arith.constant 0 : i32
    %c0_i32_0 = arith.constant 0 : i32
    %c0_i32_1 = arith.constant 0 : i32
    return %arg0, %c0_i32, %arg1, %c0_i32_0 : i32, i32, i32, i32
  }
}

</mosaic_0001>

<bundles_post_ra>
// kernel: tpu_custom_call.1
= control target key start
LH: loop header
LB: loop body
LE: loop exit
PB: predicated region body
PF: predicated region fallthrough
CT: control target
= control target key end

     0   :  { %8 = vsyncpa [#allocation5], 0  ;;  %s433_s0 = inlined_call_operand.hbm [shape: f32[4], index: 0, kind: input, shape index: {}]   ;;  %s434_s1 = inlined_call_operand.hbm [shape: f32[4], index: 1, kind: input, shape index: {}]   ;;  %s435_s2 = inlined_call_operand.hbm [shape: f32[2,4,2,128], index: 2, kind: input, shape index: {}]   ;;  %s436_s3 = inlined_call_operand.hbm [shape: f32[2,4,2,128], index: 3, kind: output, shape index: {}]  }
   0x1   :  { %9 = vsyncpa [#allocation7], 0 }
   0x2   :  { %10 = vsyncpa [#allocation3], 0 }
   0x3   :  { %11 = vsyncpa [#allocation4], 0  ;;  %s17_s14 = sshll.u32 %s433_s0, 4  ;;  %s26_s17 = sshll.u32 %s434_s1, 4  ;;  %s18_s14 = int_to_ptr.hbm [resolvable:$true] %s17_s14  ;;  %s27_s17 = int_to_ptr.hbm [resolvable:$true] %s26_s17 }
   0x4   :  { %s331_s18 = smov [#allocation2]   ;;  %s332_s19 = smov [#allocation6]  }
   0x5   :  { %20 = dma.hbm_to_smem %s18_s14, 16, %s331_s18, [#allocation5]  }
   0x6   :  { %29 = dma.hbm_to_smem %s27_s17, 16, %s332_s19, [#allocation7]  }
   0x7   :  { %s34_s22 = sshll.u32 %s435_s2, 4  ;;  %s333_s23 = smov [#allocation8]   ;;  %s35_s22 = int_to_ptr.hbm [resolvable:$true] %s34_s22 }
   0x8   :  { %s36_s24 = sshll.u32 %s333_s23, 4  ;;  %s334_s25 = smov 32   ;;  %s37_s24 = int_to_ptr.vmem [resolvable:$true] %s36_s24 }
   0x9   :  { %s335_s0 = smov 2  }
   0xa   :  { %42 = dma.hbm_to_vmem [thread:$0]  %s35_s22, 256, %s37_s24, [#allocation3], %s334_s25, %s334_s25, %s335_s0  }
   0xb   :  { %323 = dma.done.wait [#allocation5], 16  }
   0xc   :  { %324 = vsyncadd [#allocation5], 4294967280 }
   0xd   :  { %325 = dma.done.wait [#allocation7], 16  }
   0xe   :  { %326 = vsyncadd [#allocation7], 4294967280 }
   0xf   :  { %327 = dma.done.wait [#allocation3], 256  }
  0x10   :  { %328 = vsyncadd [#allocation3], 4294967040 }
  0x11   :  { %55 = sfence }
  0x12   :  { %v56_v0 = vld [vmem:[#allocation8] sm:$0x3]  ;;  %v58_v1 = vld [vmem:[#allocation8 + $0x2] sm:$0x3]  ;;  %v61_v2 = vld [vmem:[#allocation8 + $0x4] sm:$0x3] }
  0x13   :  { %v59_v3 = vadd.f32 %v58_v1, %v56_v0  ;;  %v132_v4 = vld [vmem:[#allocation8 + $0x8] sm:$0x3]  ;;  %v64_v5 = vld [vmem:[#allocation8 + $0x6] sm:$0x3]  ;;  %v134_v6 = vld [vmem:[#allocation8 + $0xa] sm:$0x3] }
  0x14   :  { %v137_v7 = vld [vmem:[#allocation8 + $0xc] sm:$0x3]  ;;  %v135_v9 = vadd.f32 %v134_v6, %v132_v4  ;;  %v140_v12 = vld [vmem:[#allocation8 + $0xe] sm:$0x3]  ;;  %s389_s1 = sld [smem:[#allocation2]]  ;;  %s336_s5 = smov [#allocation9]  }
  0x15   :  { %v62_v8 = vadd.f32 %v61_v2, %v59_v3  ;;  %s391_s2 = sld [smem:[#allocation6]]  ;;  %v98_v45 = vld [vmem:[#allocation8 + $0x2] sm:$0x3]  ;;  %v109_v47 = vld [vmem:[#allocation8 + $0x4] sm:$0x3]  ;;  %s212_s6 = sshll.u32 %s336_s5, 4  ;;  %s213_s6 = int_to_ptr.vmem [resolvable:$true] %s212_s6 }
  0x16   :  { %v138_v11 = vadd.f32 %v137_v7, %v135_v9  ;;  %s393_s26 = sld [smem:[#allocation2 + $0x1]]  ;;  %v120_v48 = vld [vmem:[#allocation8 + $0x6] sm:$0x3]  ;;  %v186_v3 = vld [vmem:[#allocation8 + $0xc] sm:$0x3]  ;;  %s214_s9 = sshll.u32 %s436_s3, 4  ;;  %s215_s9 = int_to_ptr.hbm [resolvable:$true] %s214_s9 }
  0x17   :  { %v65_v10 = vadd.f32 %v64_v5, %v62_v8  ;;  %s395_s27 = sld [smem:[#allocation6 + $0x1]] }
  0x18   :  { %v141_v14 = vadd.f32 %v140_v12, %v138_v11  ;;  %s397_s28 = sld [smem:[#allocation2 + $0x2]] }
  0x19   :  { %v369_v13 = vmul.f32 0.25, %v65_v10  ;;  %s399_s29 = sld [smem:[#allocation6 + $0x2]] }
  0x1a   :  { %v379_v24 = vmul.f32 0.25, %v141_v14  ;;  %s401_s30 = sld [smem:[#allocation2 + $0x3]]  ;;  %v92_v51 = vstv %s389_s1 }
  0x1b   :  { %v372_v15 = vsub.f32 %v56_v0, %v369_v13  ;;  %v69_v16 = vsub.f32 %v58_v1, %v369_v13  ;;  %v72_v17 = vsub.f32 %v61_v2, %v369_v13  ;;  %v75_v18 = vsub.f32 %v64_v5, %v369_v13  ;;  %s403_s4 = sld [smem:[#allocation6 + $0x3]]  ;;  %v175_v2 = vld [vmem:[#allocation8 + $0xa] sm:$0x3] }
  0x1c   :  { %v382_v26 = vsub.f32 %v132_v4, %v379_v24  ;;  %v145_v27 = vsub.f32 %v134_v6, %v379_v24  ;;  %v148_v28 = vsub.f32 %v137_v7, %v379_v24  ;;  %v151_v29 = vsub.f32 %v140_v12, %v379_v24  ;;  %v197_v4 = vld [vmem:[#allocation8 + $0xe] sm:$0x3] }
  0x1d   :  { %v68_v19 = vmul.f32 %v372_v15, %v372_v15  ;;  %v70_v20 = vmul.f32 %v69_v16, %v69_v16  ;;  %v73_v21 = vmul.f32 %v72_v17, %v72_v17  ;;  %v76_v23 = vmul.f32 %v75_v18, %v75_v18 }
  0x1e   :  { %v144_v31 = vmul.f32 %v382_v26, %v382_v26  ;;  %v146_v32 = vmul.f32 %v145_v27, %v145_v27  ;;  %v149_v33 = vmul.f32 %v148_v28, %v148_v28  ;;  %v152_v36 = vmul.f32 %v151_v29, %v151_v29 }
  0x1f   :  { %v71_v22 = vadd.f32 %v70_v20, %v68_v19  ;;  %v99_v54 = vsub.f32 %v98_v45, %v369_v13  ;;  %v102_v55 = vstv %s393_s26  ;;  %v110_v56 = vsub.f32 %v109_v47, %v369_v13 }
  0x20   :  { %v147_v35 = vadd.f32 %v146_v32, %v144_v31  ;;  %v121_v57 = vsub.f32 %v120_v48, %v369_v13  ;;  %v95_v59 = vstv %s391_s2  ;;  %v105_v60 = vstv %s395_s27 }
  0x21   :  { %v74_v25 = vadd.f32 %v73_v21, %v71_v22  ;;  %v113_v62 = vstv %s397_s28  ;;  %v116_v63 = vstv %s399_s29  ;;  %v124_v0 = vstv %s401_s30 }
  0x22   :  { %v150_v38 = vadd.f32 %v149_v33, %v147_v35  ;;  %v127_v1 = vstv %s403_s4  ;;  %v176_v12 = vsub.f32 %v175_v2, %v379_v24  ;;  %v187_v13 = vsub.f32 %v186_v3, %v379_v24 }
  0x23   :  { %v77_v30 = vadd.f32 %v76_v23, %v74_v25  ;;  %v198_v14 = vsub.f32 %v197_v4, %v379_v24 }
  0x24   :  { %v153_v39 = vadd.f32 %v152_v36, %v150_v38 }
  0x25   :  { %v78_v34 = vmul.f32 0.25, %v77_v30 }
  0x26   :  { %v154_v40 = vmul.f32 0.25, %v153_v39 }
  0x27   :  { %v79_v37 = vadd.f32 0.001, %v78_v34 }
  0x28   :  { %v155_v41 = vadd.f32 0.001, %v154_v40 }
  0x29   :  { %247 = vrsqrt.f32 %v79_v37  ;;  %vm86_vm0 = vweird.f32 %v79_v37 }
  0x2a   :  { %249 = vrsqrt.f32 %v155_v41  ;;  %vm162_vm3 = vweird.f32 %v155_v41 }
  0x2f   :  { %v248_v42 = vpop.eup %247 }
  0x30   :  { %v81_v43 = vmul.f32 %v248_v42, %v79_v37  ;;  %vm87_vm1 = vweird.f32 %v248_v42  ;;  %v250_v49 = vpop.eup %249 }
  0x31   :  { %v157_v52 = vmul.f32 %v250_v49, %v155_v41  ;;  %vm406_vm2 = vmor %vm86_vm0, %vm87_vm1  ;;  %vm163_vm4 = vweird.f32 %v250_v49 }
  0x32   :  { %v82_v44 = vmul.f32 %v248_v42, %v81_v43  ;;  %vm164_vm5 = vmor %vm162_vm3, %vm163_vm4 }
  0x33   :  { %v158_v61 = vmul.f32 %v250_v49, %v157_v52 }
  0x34   :  { %v83_v46 = vmul.f32 0.5, %v82_v44 }
  0x35   :  { %v159_v6 = vmul.f32 0.5, %v158_v61 }
  0x36   :  { %v84_v50 = vsub.f32 1.5, %v83_v46 }
  0x37   :  { %v160_v11 = vsub.f32 1.5, %v159_v6 }
  0x38   :  { %v85_v58 = vmul.f32 %v248_v42, %v84_v50 }
  0x39   :  { %v161_v20 = vmul.f32 %v250_v49, %v160_v11 }
  0x3a   :  { %v89_v5 = vsel %vm406_vm2, %v248_v42, %v85_v58 }
  0x3b   :  { %v90_v7 = vmul.f32 %v89_v5, %v372_v15  ;;  %v100_v8 = vmul.f32 %v99_v54, %v89_v5  ;;  %v111_v9 = vmul.f32 %v110_v56, %v89_v5  ;;  %v122_v10 = vmul.f32 %v121_v57, %v89_v5 }
  0x3c   :  { %v165_v25 = vsel %vm164_vm5, %v250_v49, %v161_v20 }
  0x3d   :  { %v93_v16 = vmul.f32 %v92_v51, %v90_v7  ;;  %v103_v17 = vmul.f32 %v102_v55, %v100_v8  ;;  %v114_v18 = vmul.f32 %v113_v62, %v111_v9  ;;  %v125_v19 = vmul.f32 %v124_v0, %v122_v10 }
  0x3e   :  { %v166_v27 = vmul.f32 %v165_v25, %v382_v26  ;;  %v177_v28 = vmul.f32 %v176_v12, %v165_v25  ;;  %v188_v29 = vmul.f32 %v187_v13, %v165_v25  ;;  %v199_v30 = vmul.f32 %v198_v14, %v165_v25 }
  0x3f   :  { %v96_v21 = vadd.f32 %v95_v59, %v93_v16  ;;  %v106_v22 = vadd.f32 %v105_v60, %v103_v17  ;;  %v117_v23 = vadd.f32 %v116_v63, %v114_v18  ;;  %v128_v15 = vadd.f32 %v127_v1, %v125_v19 }
  0x40   :  { %v169_v24 = vmul.f32 %v166_v27, %v92_v51  ;;  %v180_v31 = vmul.f32 %v177_v28, %v102_v55  ;;  %v191_v32 = vmul.f32 %v188_v29, %v113_v62  ;;  %v202_v33 = vmul.f32 %v199_v30, %v124_v0 }
  0x41   :  { %97 = vst [vmem:[#allocation9] sm:$0x3] %v96_v21 }
  0x42   :  { %108 = vst [vmem:[#allocation9 + $0x2] sm:$0x3] %v106_v22  ;;  %v172_v34 = vadd.f32 %v169_v24, %v95_v59  ;;  %v183_v35 = vadd.f32 %v180_v31, %v105_v60  ;;  %v194_v36 = vadd.f32 %v191_v32, %v116_v63  ;;  %v205_v26 = vadd.f32 %v202_v33, %v127_v1 }
  0x43   :  { %119 = vst [vmem:[#allocation9 + $0x4] sm:$0x3] %v117_v23 }
  0x44   :  { %130 = vst [vmem:[#allocation9 + $0x6] sm:$0x3] %v128_v15 }
  0x45   :  { %174 = vst [vmem:[#allocation9 + $0x8] sm:$0x3] %v172_v34 }
  0x46   :  { %185 = vst [vmem:[#allocation9 + $0xa] sm:$0x3] %v183_v35 }
  0x47   :  { %196 = vst [vmem:[#allocation9 + $0xc] sm:$0x3] %v194_v36 }
  0x48   :  { %207 = vst [vmem:[#allocation9 + $0xe] sm:$0x3] %v205_v26 }
  0x49   :  { %220 = dma.vmem_to_hbm [thread:$0]  %s213_s6, 256, %s215_s9, [#allocation4], %s334_s25, %s334_s25, %s335_s0  }
  0x4a   :  { %329 = dma.done.wait [#allocation4], 256  }
  0x4b   :  { %330 = vsyncadd [#allocation4], 4294967040 }
  0x4c   :  { %225 = vsyncpa [#allocation3], 1 }
  0x4d   :  { %226 = vsyncpa [#allocation4], 1 }
  0x4e   :  { %227 = vsyncpa [#allocation5], 1 }
  0x4f   :  { %228 = vsyncpa [#allocation7], 1 }

</bundles_post_ra>
